<compile_context>
chip_gen: v5e
topology: v5e:2x2
jax: 0.10.0
libtpu: 0.0.40
codegen_flags: <defaults>
</compile_context>

<pallas_src>
import functools

import jax
import jax.numpy as jnp
from jax.experimental import pallas as pl
from jax.experimental.pallas import tpu as pltpu


def gated_attention_kernel(x_ref, w_in_ref, b_in_ref, wo_ref, bo_ref,
                           wgx_ref, wga_ref, bg_ref, gamma_ref, beta_ref,
                           o_ref, *, nhead):
    x = x_ref[0]                           # (S, E)
    S, E = x.shape
    H = nhead
    D = E // H
    scale = 1.0 / (D ** 0.5)

    # ---- in-projection, already per-head: (3H,S,E) x (3H,E,D) -> (3H,S,D) ----
    xg = jnp.broadcast_to(x, (3 * H, S, E))
    qkv = jnp.einsum('gse,ged->gsd', xg, w_in_ref[...],
                     preferred_element_type=jnp.float32) + b_in_ref[...]
    q = qkv[:H]                            # leading-dim slices: no relayout
    k = qkv[H:2 * H]
    v = qkv[2 * H:]

    # ---- batched per-head scaled dot-product attention ----
    s = jnp.einsum('hqd,hkd->hqk', q, k,
                   preferred_element_type=jnp.float32) * scale   # (H, S, S)
    s = s - jnp.max(s, axis=-1, keepdims=True)
    p = jnp.exp(s)
    # EUP reciprocal instead of a VPU divide sequence (approx=True in prod).
    p = p * pl.reciprocal(jnp.sum(p, axis=-1, keepdims=True), approx=False)
    o_heads = jnp.einsum('hqk,hkd->hqd', p, v,
                         preferred_element_type=jnp.float32)     # (H, S, D)

    # ---- out-projection folded per head, reduced over heads (no concat) ----
    attn_parts = jnp.einsum('hqd,hde->hqe', o_heads, wo_ref[...],
                            preferred_element_type=jnp.float32)  # (H, S, E)
    attn_out = jnp.sum(attn_parts, axis=0) + bo_ref[...]          # (S, E)

    # ---- sigmoid gate on concat([x, attn_out]) as two matmuls ----
    gate_logits = (jnp.dot(x, wgx_ref[...], preferred_element_type=jnp.float32)
                   + jnp.dot(attn_out, wga_ref[...],
                             preferred_element_type=jnp.float32)
                   + bg_ref[...])
    gated = jax.nn.sigmoid(gate_logits) * attn_out

    # ---- residual + LayerNorm (eps=1e-5, biased variance) ----
    y = x + gated
    mean = jnp.mean(y, axis=-1, keepdims=True)
    var = jnp.mean((y - mean) ** 2, axis=-1, keepdims=True)
    yn = (y - mean) * jax.lax.rsqrt(var + 1e-5)
    o_ref[0] = yn * gamma_ref[...] + beta_ref[...]


def gated_attention(x, params, *, nhead):
    """x: (B, S, E).  params in torch layout:
       in_w (3E,E), in_b (3E,), out_w (E,E), out_b (E,),
       gate_w (E,2E), gate_b (E,), gamma (E,), beta (E,)."""
    B, S, E = x.shape
    H = nhead
    D = E // H
    in_w, in_b, out_w, out_b, gate_w, gate_b, gamma, beta = params

    # ---- host-side weight prep (free): pre-split / pre-transpose ----
    w_in_heads = in_w.reshape(3 * H, D, E).transpose(0, 2, 1)   # (3H, E, D)
    b_in_heads = in_b.reshape(3 * H, 1, D)                      # (3H, 1, D)
    wo_heads = out_w.T.reshape(H, D, E)                         # (H, D, E)
    bo = out_b.reshape(1, E)
    wg_x = gate_w[:, :E].T                                      # (E, E)
    wg_a = gate_w[:, E:].T                                      # (E, E)
    bg = gate_b.reshape(1, E)
    gamma2 = gamma.reshape(1, E)
    beta2 = beta.reshape(1, E)

    def full_spec(shape):
        nd = len(shape)
        # Constant index map: Pallas keeps the block resident across grid steps.
        return pl.BlockSpec(shape, lambda b, _nd=nd: (0,) * _nd)

    flops = B * (2 * S * E * 3 * E          # qkv projection
                 + 2 * 2 * H * S * S * D    # scores + attn @ v
                 + 2 * S * E * E            # out projection
                 + 2 * 2 * S * E * E)       # gate (two halves)
    transcendentals = B * (H * S * S + S * E + H * S + 2 * S)
    bytes_accessed = 4 * (2 * x.size + in_w.size + in_b.size + out_w.size
                          + out_b.size + gate_w.size + gate_b.size
                          + gamma.size + beta.size)

    kernel = functools.partial(gated_attention_kernel, nhead=nhead)
    return pl.pallas_call(
        kernel,
        out_shape=jax.ShapeDtypeStruct((B, S, E), x.dtype),
        grid=(B,),
        in_specs=[
            pl.BlockSpec((1, S, E), lambda b: (b, 0, 0)),
            full_spec(w_in_heads.shape), full_spec(b_in_heads.shape),
            full_spec(wo_heads.shape), full_spec(bo.shape),
            full_spec(wg_x.shape), full_spec(wg_a.shape), full_spec(bg.shape),
            full_spec(gamma2.shape), full_spec(beta2.shape),
        ],
        out_specs=pl.BlockSpec((1, S, E), lambda b: (b, 0, 0)),
        compiler_params=pltpu.CompilerParams(
            dimension_semantics=("parallel",)),
        cost_estimate=pl.CostEstimate(
            flops=flops, transcendentals=transcendentals,
            bytes_accessed=bytes_accessed),
    )(x, w_in_heads, b_in_heads, wo_heads, bo, wg_x, wg_a, bg, gamma2, beta2)


def reference(x, params, *, nhead):
    """Pure-JAX reference mirroring torch.nn semantics (eval mode)."""
    in_w, in_b, out_w, out_b, gate_w, gate_b, gamma, beta = params
    B, S, E = x.shape
    D = E // nhead
    qkv = jnp.einsum('bse,fe->bsf', x, in_w) + in_b
    q, k, v = jnp.split(qkv, 3, axis=-1)

    def heads(t):  # (B,S,E) -> (B,H,S,D)
        return t.reshape(B, S, nhead, D).transpose(0, 2, 1, 3)

    qh, kh, vh = heads(q), heads(k), heads(v)
    s = jnp.einsum('bhqd,bhkd->bhqk', qh, kh) / (D ** 0.5)
    p = jax.nn.softmax(s, axis=-1)
    a = jnp.einsum('bhqk,bhkd->bhqd', p, vh).transpose(0, 2, 1, 3).reshape(B, S, E)
    attn_out = jnp.einsum('bse,fe->bsf', a, out_w) + out_b
    cat = jnp.concatenate([x, attn_out], axis=-1)
    gated = jax.nn.sigmoid(jnp.einsum('bsf,ef->bse', cat, gate_w) + gate_b) * attn_out
    y = x + gated
    mean = jnp.mean(y, axis=-1, keepdims=True)
    var = jnp.mean((y - mean) ** 2, axis=-1, keepdims=True)
    return (y - mean) * jax.lax.rsqrt(var + 1e-5) * gamma + beta


if __name__ == "__main__":
    B, S, E, H = 2, 8, 32, 4
    key = jax.random.PRNGKey(0)
    ks = jax.random.split(key, 8)

    x = jax.random.normal(ks[0], (B, S, E), dtype=jnp.float32)

    # Deterministic synthetic parameters in the torch layouts.
    in_w = jax.random.normal(ks[1], (3 * E, E), jnp.float32) * 0.1   # in_proj_weight
    in_b = jax.random.normal(ks[2], (3 * E,), jnp.float32) * 0.1     # in_proj_bias
    out_w = jax.random.normal(ks[3], (E, E), jnp.float32) * 0.1      # out_proj.weight
    out_b = jax.random.normal(ks[4], (E,), jnp.float32) * 0.1        # out_proj.bias
    gate_w = jax.random.normal(ks[5], (E, 2 * E), jnp.float32) * 0.1  # gate.weight
    gate_b = jax.random.normal(ks[6], (E,), jnp.float32) * 0.1        # gate.bias
    gamma = jnp.ones((E,), jnp.float32)                               # norm.weight
    beta = jnp.zeros((E,), jnp.float32)                               # norm.bias

    params = (in_w, in_b, out_w, out_b, gate_w, gate_b, gamma, beta)

    out = jax.block_until_ready(gated_attention(x, params, nhead=H))
    ref = jax.block_until_ready(reference(x, params, nhead=H))

    assert out.shape == (B, S, E)
    assert jnp.allclose(out, ref, atol=1e-4, rtol=1e-4), \
        f"mismatch vs reference, max |diff| = {float(jnp.max(jnp.abs(out - ref)))}"

    print("KERNEL_OK")
</pallas_src>

<mosaic_0001>
module attributes {stable_mosaic.version = 11 : i64} {
  func.func @gated_attention_kernel(%arg0: i32, %arg1: memref<1x8x32xf32, #tpu.memory_space<vmem>>, %arg2: memref<12x32x8xf32, #tpu.memory_space<vmem>>, %arg3: memref<12x1x8xf32, #tpu.memory_space<vmem>>, %arg4: memref<4x8x32xf32, #tpu.memory_space<vmem>>, %arg5: memref<1x32xf32, #tpu.memory_space<vmem>>, %arg6: memref<32x32xf32, #tpu.memory_space<vmem>>, %arg7: memref<32x32xf32, #tpu.memory_space<vmem>>, %arg8: memref<1x32xf32, #tpu.memory_space<vmem>>, %arg9: memref<1x32xf32, #tpu.memory_space<vmem>>, %arg10: memref<1x32xf32, #tpu.memory_space<vmem>>, %arg11: memref<1x8x32xf32, #tpu.memory_space<vmem>>) attributes {dimension_semantics = [#tpu.dimension_semantics<parallel>], iteration_bounds = array<i64: 2>, scalar_prefetch = 0 : i64, scratch_operands = 0 : i64, tpu.core_type = #tpu.core_type<tc>, window_params = [{transform_indices = @transform_0, window_bounds = array<i64: 1, 8, 32>}, {pipeline_mode = #tpu.pipeline_mode<synchronous>, transform_indices = @transform_1, window_bounds = array<i64: 12, 32, 8>}, {pipeline_mode = #tpu.pipeline_mode<synchronous>, transform_indices = @transform_2, window_bounds = array<i64: 12, 1, 8>}, {pipeline_mode = #tpu.pipeline_mode<synchronous>, transform_indices = @transform_3, window_bounds = array<i64: 4, 8, 32>}, {pipeline_mode = #tpu.pipeline_mode<synchronous>, transform_indices = @transform_4, window_bounds = array<i64: 1, 32>}, {pipeline_mode = #tpu.pipeline_mode<synchronous>, transform_indices = @transform_5, window_bounds = array<i64: 32, 32>}, {pipeline_mode = #tpu.pipeline_mode<synchronous>, transform_indices = @transform_6, window_bounds = array<i64: 32, 32>}, {pipeline_mode = #tpu.pipeline_mode<synchronous>, transform_indices = @transform_7, window_bounds = array<i64: 1, 32>}, {pipeline_mode = #tpu.pipeline_mode<synchronous>, transform_indices = @transform_8, window_bounds = array<i64: 1, 32>}, {pipeline_mode = #tpu.pipeline_mode<synchronous>, transform_indices = @transform_9, window_bounds = array<i64: 1, 32>}, {transform_indices = @transform_10, window_bounds = array<i64: 1, 8, 32>}]} {
    %c0 = arith.constant 0 : index
    %c0_0 = arith.constant 0 : index
    %c0_1 = arith.constant 0 : index
    %0 = vector.load %arg1[%c0, %c0_0, %c0_1] : memref<1x8x32xf32, #tpu.memory_space<vmem>>, vector<1x8x32xf32>
    %1 = vector.shape_cast %0 : vector<1x8x32xf32> to vector<8x32xf32>
    %2 = vector.shape_cast %1 : vector<8x32xf32> to vector<1x8x32xf32>
    %3 = vector.broadcast %2 : vector<1x8x32xf32> to vector<12x8x32xf32>
    %c0_2 = arith.constant 0 : index
    %c0_3 = arith.constant 0 : index
    %c0_4 = arith.constant 0 : index
    %4 = vector.load %arg2[%c0_2, %c0_3, %c0_4] : memref<12x32x8xf32, #tpu.memory_space<vmem>>, vector<12x32x8xf32>
    "tpu.trace_start"() <{level = 10 : i32, message = "gse,ged->gsd"}> : () -> ()
    %cst = arith.constant dense<0.000000e+00> : vector<12x8x8xf32>
    %5 = tpu.matmul %3, %4, %cst {dimension_numbers = #tpu.dot_dimension_numbers<[2], [1], [1], [2], [0, 0, 0, 1, 1, 2], [0], [0]>} : vector<12x8x32xf32>, vector<12x32x8xf32>, vector<12x8x8xf32> -> vector<12x8x8xf32>
    "tpu.trace_stop"() : () -> ()
    %c0_5 = arith.constant 0 : index
    %c0_6 = arith.constant 0 : index
    %c0_7 = arith.constant 0 : index
    %6 = vector.load %arg3[%c0_5, %c0_6, %c0_7] : memref<12x1x8xf32, #tpu.memory_space<vmem>>, vector<12x1x8xf32>
    %7 = vector.broadcast %6 : vector<12x1x8xf32> to vector<12x8x8xf32>
    %8 = arith.addf %5, %7 : vector<12x8x8xf32>
    %9 = vector.extract_strided_slice %8 {offsets = [0, 0, 0], sizes = [4, 8, 8], strides = [1, 1, 1]} : vector<12x8x8xf32> to vector<4x8x8xf32>
    %10 = vector.extract_strided_slice %8 {offsets = [4, 0, 0], sizes = [4, 8, 8], strides = [1, 1, 1]} : vector<12x8x8xf32> to vector<4x8x8xf32>
    %11 = vector.extract_strided_slice %8 {offsets = [8, 0, 0], sizes = [4, 8, 8], strides = [1, 1, 1]} : vector<12x8x8xf32> to vector<4x8x8xf32>
    "tpu.trace_start"() <{level = 10 : i32, message = "hqd,hkd->hqk"}> : () -> ()
    %cst_8 = arith.constant dense<0.000000e+00> : vector<4x8x8xf32>
    %12 = tpu.matmul %9, %10, %cst_8 {dimension_numbers = #tpu.dot_dimension_numbers<[2], [2], [1], [1], [0, 0, 0, 1, 1, 1], [0], [0]>} : vector<4x8x8xf32>, vector<4x8x8xf32>, vector<4x8x8xf32> -> vector<4x8x8xf32>
    "tpu.trace_stop"() : () -> ()
    %cst_9 = arith.constant 0.353553385 : f32
    %13 = vector.broadcast %cst_9 : f32 to vector<4x8x8xf32>
    %14 = arith.mulf %12, %13 : vector<4x8x8xf32>
    %cst_10 = arith.constant dense<0xFF800000> : vector<4x8xf32>
    %15 = vector.multi_reduction <maximumf>, %14, %cst_10 [2] : vector<4x8x8xf32> to vector<4x8xf32>
    %16 = vector.shape_cast %15 : vector<4x8xf32> to vector<4x8x1xf32>
    %17 = vector.broadcast %16 : vector<4x8x1xf32> to vector<4x8x8xf32>
    %18 = arith.subf %14, %17 : vector<4x8x8xf32>
    %19 = math.exp %18 : vector<4x8x8xf32>
    %cst_11 = arith.constant dense<0.000000e+00> : vector<4x8xf32>
    %20 = vector.multi_reduction <add>, %19, %cst_11 [2] : vector<4x8x8xf32> to vector<4x8xf32>
    %21 = vector.shape_cast %20 : vector<4x8xf32> to vector<4x8x1xf32>
    %22 = tpu.reciprocal %21 : vector<4x8x1xf32> -> vector<4x8x1xf32>
    %23 = vector.broadcast %22 : vector<4x8x1xf32> to vector<4x8x8xf32>
    %24 = arith.mulf %19, %23 : vector<4x8x8xf32>
    "tpu.trace_start"() <{level = 10 : i32, message = "hqk,hkd->hqd"}> : () -> ()
    %cst_12 = arith.constant dense<0.000000e+00> : vector<4x8x8xf32>
    %25 = tpu.matmul %24, %11, %cst_12 {dimension_numbers = #tpu.dot_dimension_numbers<[2], [1], [1], [2], [0, 0, 0, 1, 1, 2], [0], [0]>} : vector<4x8x8xf32>, vector<4x8x8xf32>, vector<4x8x8xf32> -> vector<4x8x8xf32>
    "tpu.trace_stop"() : () -> ()
    %c0_13 = arith.constant 0 : index
    %c0_14 = arith.constant 0 : index
    %c0_15 = arith.constant 0 : index
    %26 = vector.load %arg4[%c0_13, %c0_14, %c0_15] : memref<4x8x32xf32, #tpu.memory_space<vmem>>, vector<4x8x32xf32>
    "tpu.trace_start"() <{level = 10 : i32, message = "hqd,hde->hqe"}> : () -> ()
    %cst_16 = arith.constant dense<0.000000e+00> : vector<4x8x32xf32>
    %27 = tpu.matmul %25, %26, %cst_16 {dimension_numbers = #tpu.dot_dimension_numbers<[2], [1], [1], [2], [0, 0, 0, 1, 1, 2], [0], [0]>} : vector<4x8x8xf32>, vector<4x8x32xf32>, vector<4x8x32xf32> -> vector<4x8x32xf32>
    "tpu.trace_stop"() : () -> ()
    %cst_17 = arith.constant dense<0.000000e+00> : vector<8x32xf32>
    %28 = vector.multi_reduction <add>, %27, %cst_17 [0] : vector<4x8x32xf32> to vector<8x32xf32>
    %c0_18 = arith.constant 0 : index
    %c0_19 = arith.constant 0 : index
    %29 = vector.load %arg5[%c0_18, %c0_19] : memref<1x32xf32, #tpu.memory_space<vmem>>, vector<1x32xf32>
    %30 = vector.broadcast %29 : vector<1x32xf32> to vector<8x32xf32>
    %31 = arith.addf %28, %30 : vector<8x32xf32>
    %c0_20 = arith.constant 0 : index
    %c0_21 = arith.constant 0 : index
    %32 = vector.load %arg6[%c0_20, %c0_21] : memref<32x32xf32, #tpu.memory_space<vmem>>, vector<32x32xf32>
    %cst_22 = arith.constant dense<0.000000e+00> : vector<8x32xf32>
    %33 = tpu.matmul %1, %32, %cst_22 {dimension_numbers = #tpu.dot_dimension_numbers<[1], [0], [0], [1], [0, 0, 1, 1], [], []>} : vector<8x32xf32>, vector<32x32xf32>, vector<8x32xf32> -> vector<8x32xf32>
    %c0_23 = arith.constant 0 : index
    %c0_24 = arith.constant 0 : index
    %34 = vector.load %arg7[%c0_23, %c0_24] : memref<32x32xf32, #tpu.memory_space<vmem>>, vector<32x32xf32>
    %cst_25 = arith.constant dense<0.000000e+00> : vector<8x32xf32>
    %35 = tpu.matmul %31, %34, %cst_25 {dimension_numbers = #tpu.dot_dimension_numbers<[1], [0], [0], [1], [0, 0, 1, 1], [], []>} : vector<8x32xf32>, vector<32x32xf32>, vector<8x32xf32> -> vector<8x32xf32>
    %36 = arith.addf %33, %35 : vector<8x32xf32>
    %c0_26 = arith.constant 0 : index
    %c0_27 = arith.constant 0 : index
    %37 = vector.load %arg8[%c0_26, %c0_27] : memref<1x32xf32, #tpu.memory_space<vmem>>, vector<1x32xf32>
    %38 = vector.broadcast %37 : vector<1x32xf32> to vector<8x32xf32>
    %39 = arith.addf %36, %38 : vector<8x32xf32>
    %40 = arith.negf %39 : vector<8x32xf32>
    %41 = math.exp %40 : vector<8x32xf32>
    %cst_28 = arith.constant 1.000000e+00 : f32
    %42 = vector.broadcast %cst_28 : f32 to vector<8x32xf32>
    %43 = arith.addf %42, %41 : vector<8x32xf32>
    %44 = arith.divf %42, %43 : vector<8x32xf32>
    %45 = arith.mulf %44, %31 : vector<8x32xf32>
    %46 = arith.addf %1, %45 : vector<8x32xf32>
    %cst_29 = arith.constant dense<0.000000e+00> : vector<8xf32>
    %47 = vector.multi_reduction <add>, %46, %cst_29 [1] : vector<8x32xf32> to vector<8xf32>
    %48 = vector.shape_cast %47 : vector<8xf32> to vector<8x1xf32>
    %cst_30 = arith.constant 3.200000e+01 : f32
    %49 = vector.broadcast %cst_30 : f32 to vector<8x1xf32>
    %50 = arith.divf %48, %49 : vector<8x1xf32>
    %51 = vector.broadcast %50 : vector<8x1xf32> to vector<8x32xf32>
    %52 = arith.subf %46, %51 : vector<8x32xf32>
    %53 = arith.mulf %52, %52 : vector<8x32xf32>
    %cst_31 = arith.constant dense<0.000000e+00> : vector<8xf32>
    %54 = vector.multi_reduction <add>, %53, %cst_31 [1] : vector<8x32xf32> to vector<8xf32>
    %55 = vector.shape_cast %54 : vector<8xf32> to vector<8x1xf32>
    %cst_32 = arith.constant 3.200000e+01 : f32
    %56 = vector.broadcast %cst_32 : f32 to vector<8x1xf32>
    %57 = arith.divf %55, %56 : vector<8x1xf32>
    %58 = vector.broadcast %50 : vector<8x1xf32> to vector<8x32xf32>
    %59 = arith.subf %46, %58 : vector<8x32xf32>
    %cst_33 = arith.constant 9.99999974E-6 : f32
    %60 = vector.broadcast %cst_33 : f32 to vector<8x1xf32>
    %61 = arith.addf %57, %60 : vector<8x1xf32>
    %62 = math.rsqrt %61 : vector<8x1xf32>
    %63 = vector.broadcast %62 : vector<8x1xf32> to vector<8x32xf32>
    %64 = arith.mulf %59, %63 : vector<8x32xf32>
    %c0_34 = arith.constant 0 : index
    %c0_35 = arith.constant 0 : index
    %65 = vector.load %arg9[%c0_34, %c0_35] : memref<1x32xf32, #tpu.memory_space<vmem>>, vector<1x32xf32>
    %66 = vector.broadcast %65 : vector<1x32xf32> to vector<8x32xf32>
    %67 = arith.mulf %64, %66 : vector<8x32xf32>
    %c0_36 = arith.constant 0 : index
    %c0_37 = arith.constant 0 : index
    %68 = vector.load %arg10[%c0_36, %c0_37] : memref<1x32xf32, #tpu.memory_space<vmem>>, vector<1x32xf32>
    %69 = vector.broadcast %68 : vector<1x32xf32> to vector<8x32xf32>
    %70 = arith.addf %67, %69 : vector<8x32xf32>
    %c0_38 = arith.constant 0 : index
    %c0_39 = arith.constant 0 : index
    %c0_40 = arith.constant 0 : index
    %71 = vector.load %arg11[%c0_38, %c0_39, %c0_40] : memref<1x8x32xf32, #tpu.memory_space<vmem>>, vector<1x8x32xf32>
    %72 = vector.shape_cast %71 : vector<1x8x32xf32> to vector<8x32xf32>
    %73 = vector.shape_cast %70 : vector<8x32xf32> to vector<1x8x32xf32>
    tpu.vector_store %arg11[%c0_38, %c0_39, %c0_40], %73 {strides = array<i32>} : memref<1x8x32xf32, #tpu.memory_space<vmem>>, vector<1x8x32xf32>,
    return
  }
  func.func @transform_0(%arg0: i32) -> (i32, i32, i32) {
    %c0_i32 = arith.constant 0 : i32
    %c0_i32_0 = arith.constant 0 : i32
    %c0_i32_1 = arith.constant 0 : i32
    return %arg0, %c0_i32, %c0_i32_0 : i32, i32, i32
  }
  func.func @transform_1(%arg0: i32) -> (i32, i32, i32) {
    %c0_i32 = arith.constant 0 : i32
    %c0_i32_0 = arith.constant 0 : i32
    %c0_i32_1 = arith.constant 0 : i32
    %c0_i32_2 = arith.constant 0 : i32
    return %c0_i32, %c0_i32_0, %c0_i32_1 : i32, i32, i32
  }
  func.func @transform_2(%arg0: i32) -> (i32, i32, i32) {
    %c0_i32 = arith.constant 0 : i32
    %c0_i32_0 = arith.constant 0 : i32
    %c0_i32_1 = arith.constant 0 : i32
    %c0_i32_2 = arith.constant 0 : i32
    return %c0_i32, %c0_i32_0, %c0_i32_1 : i32, i32, i32
  }
  func.func @transform_3(%arg0: i32) -> (i32, i32, i32) {
    %c0_i32 = arith.constant 0 : i32
    %c0_i32_0 = arith.constant 0 : i32
    %c0_i32_1 = arith.constant 0 : i32
    %c0_i32_2 = arith.constant 0 : i32
    return %c0_i32, %c0_i32_0, %c0_i32_1 : i32, i32, i32
  }
  func.func @transform_4(%arg0: i32) -> (i32, i32) {
    %c0_i32 = arith.constant 0 : i32
    %c0_i32_0 = arith.constant 0 : i32
    %c0_i32_1 = arith.constant 0 : i32
    return %c0_i32, %c0_i32_0 : i32, i32
  }
  func.func @transform_5(%arg0: i32) -> (i32, i32) {
    %c0_i32 = arith.constant 0 : i32
    %c0_i32_0 = arith.constant 0 : i32
    %c0_i32_1 = arith.constant 0 : i32
    return %c0_i32, %c0_i32_0 : i32, i32
  }
  func.func @transform_6(%arg0: i32) -> (i32, i32) {
    %c0_i32 = arith.constant 0 : i32
    %c0_i32_0 = arith.constant 0 : i32
    %c0_i32_1 = arith.constant 0 : i32
    return %c0_i32, %c0_i32_0 : i32, i32
  }
  func.func @transform_7(%arg0: i32) -> (i32, i32) {
    %c0_i32 = arith.constant 0 : i32
    %c0_i32_0 = arith.constant 0 : i32
    %c0_i32_1 = arith.constant 0 : i32
    return %c0_i32, %c0_i32_0 : i32, i32
  }
  func.func @transform_8(%arg0: i32) -> (i32, i32) {
    %c0_i32 = arith.constant 0 : i32
    %c0_i32_0 = arith.constant 0 : i32
    %c0_i32_1 = arith.constant 0 : i32
    return %c0_i32, %c0_i32_0 : i32, i32
  }
  func.func @transform_9(%arg0: i32) -> (i32, i32) {
    %c0_i32 = arith.constant 0 : i32
    %c0_i32_0 = arith.constant 0 : i32
    %c0_i32_1 = arith.constant 0 : i32
    return %c0_i32, %c0_i32_0 : i32, i32
  }
  func.func @transform_10(%arg0: i32) -> (i32, i32, i32) {
    %c0_i32 = arith.constant 0 : i32
    %c0_i32_0 = arith.constant 0 : i32
    %c0_i32_1 = arith.constant 0 : i32
    return %arg0, %c0_i32, %c0_i32_0 : i32, i32, i32
  }
}

</mosaic_0001>

<bundles_post_ra>
// kernel: tpu_custom_call.1
= control target key start
LH: loop header
LB: loop body
LE: loop exit
PB: predicated region body
PF: predicated region fallthrough
CT: control target
= control target key end

     0   :  { %15 = vsyncpa [#allocation3], 0  ;;  %s1916_s0 = inlined_call_operand.vmem [shape: f32[2,8,32], index: 0, kind: input, shape index: {}]   ;;  %s1917_s1 = inlined_call_operand.vmem [shape: f32[12,32,8], index: 1, kind: input, shape index: {}]   ;;  %s1918_s2 = inlined_call_operand.vmem [shape: f32[12,1,8], index: 2, kind: input, shape index: {}]   ;;  %s1919_s3 = inlined_call_operand.vmem [shape: f32[4,8,32], index: 3, kind: input, shape index: {}]   ;;  %s1920_s4 = inlined_call_operand.vmem [shape: f32[1,32], index: 4, kind: input, shape index: {}]   ;;  %s1921_s5 = inlined_call_operand.vmem [shape: f32[32,32], index: 5, kind: input, shape index: {}]   ;;  %s1922_s6 = inlined_call_operand.vmem [shape: f32[32,32], index: 6, kind: input, shape index: {}]   ;;  %s1923_s7 = inlined_call_operand.vmem [shape: f32[1,32], index: 7, kind: input, shape index: {}]   ;;  %s1924_s8 = inlined_call_operand.vmem [shape: f32[1,32], index: 8, kind: input, shape index: {}]   ;;  %s1925_s9 = inlined_call_operand.vmem [shape: f32[1,32], index: 9, kind: input, shape index: {}]   ;;  %s1926_s10 = inlined_call_operand.hbm [shape: f32[2,8,32], index: 10, kind: output, shape index: {}]  }
   0x1   :  { %17 = vsyncpa [#allocation3 + $0x1], 0  ;;  %s1534_s13 = smov 0   ;;  %s1536_s14 = smov 0  }
   0x2   :  { %s1538_s15 = smov 0   ;;  %s1540_s16 = smov 0  }
   0x3 LB: > { %s1555_s17 = sadd.s32 4294967295, %s1476_s16   ;;  %s1293_s18 = sadd.s32 4294967294, %s1476_s16   ;;  %s1476_s16 = sphi %s1540_s16, %s1934_s16   ;;  %s1472_s15 = sphi %s1538_s15, %s1933_s15   ;;  %s1468_s14 = sphi %s1536_s14, %s1932_s14   ;;  %s1464_s13 = sphi %s1534_s13, %s1931_s13  }
   0x4   : > { %s1559_s19 = sadd.s32 1, %s1476_s16   ;;  %s245_s20 = sadd.s32 1, %s1472_s15 }
   0x5   : > { %s242_s21 = ssub.s32 %s1476_s16, %s1559_s19  ;;  %p255_p0 = scmp.ne.s32.totalorder %s1472_s15, %s1468_s14 }
   0x6   : > { %p243_p1 = scmp.eq.s32.totalorder %s242_s21, 0  ;;  %p256_p2 = scmp.eq.s32.totalorder %s1555_s17, 1 }
   0x7   : > { %p261_p3 = scmp.ne.s32.totalorder %s1468_s14, %s1464_s13  ;;  %p262_p4 = scmp.eq.s32.totalorder %s1293_s18, 1 }
   0x8   : > { %s1570_s22 = scalar_select %p243_p1, %s1472_s15, %s245_s20  }
   0x9   : > { %p1572_p5 = por %p256_p2, %p255_p0  ;;  %p1576_p6 = por %p262_p4, %p261_p3 }
   0xa   : > { %1927 = sst [smem:[#allocation5_spill]] %s1570_s22  ;;  %p1296_p7 = scmp.ge.s32.totalorder %s1476_s16, 1 }
   0xb   : > { %p314_p8 = scmp.lt.s32.totalorder %s1476_s16, 3 }
   0xd   : > { %p315_p9 = pnand %p1296_p7, %p314_p8 }
   0xe   : > { %p351_p10 = scmp.lt.s32.totalorder (!%p315_p9), %s1555_s17, 1  ;;  %s348_s21 = sand.u32 (!%p315_p9), 1, %s1468_s14  }
   0xf   : > { %318 = sbr.rel (%p315_p9) target bundleno = 1283 (0x503), region = 60  ;;  %s1297_s25 = sshll.u32 (!%p315_p9), %s348_s21, 3 }
  0x10   : > { %s1331_s22 = sshll.u32 (!%p315_p9), %s1555_s17, 3  ;;  %s1219_s27 = scalar_lea.sflag (!%p315_p9), [#allocation3], %s348_s21 }
  0x11   : > { %s1229_s11 = scalar_lea.hbm (!%p315_p9), %s1926_s10, %s1331_s22 }
  0x12   : > { %s1233_s20 = sshll.u32 (!%p315_p9), %s1229_s11, 4  ;;  %s1234_s20 = int_to_ptr.hbm [resolvable:$true] %s1233_s20 }
  0x14   : > { %v359_v0 = vld [vmem:[%s1917_s1 + $0x18] sm:$0xff]  ;;  %v358_v3 = vld [vmem:[%s1917_s1 + $0x10] sm:$0xff]  ;;  %v357_v6 = vld [vmem:[%s1917_s1 + $0x8] sm:$0xff]  ;;  %s352_s30 = scalar_select %p351_p10, %s1555_s17, 1  ;;  %vm452_vm0 = vcmask 261120   ;;  %vm696_vm1 = vcmask 64512  }
  0x15   : > { %v367_v1 = vld [vmem:[%s1917_s1 + $0x58] sm:$0xff]  ;;  %468 = vmatpush.msra.mxu0 %v359_v0  ;;  %v366_v4 = vld [vmem:[%s1917_s1 + $0x50] sm:$0xff]  ;;  %v365_v7 = vld [vmem:[%s1917_s1 + $0x48] sm:$0xff] }
  0x16   : > { %v371_v2 = vld [vmem:[%s1917_s1 + $0x78] sm:$0xff]  ;;  %508 = vmatpush.msra.mxu2 %v367_v1  ;;  %v370_v5 = vld [vmem:[%s1917_s1 + $0x70] sm:$0xff]  ;;  %v369_v8 = vld [vmem:[%s1917_s1 + $0x68] sm:$0xff]  ;;  %s1298_s26 = sshll.u32 %s352_s30, 3  ;;  %s350_s30 = scalar_lea.vmem [#allocation2], %s1297_s25 }
  0x17   : > { %528 = vmatpush.msra.mxu3 %v371_v2  ;;  %469 = vmatpush.msra.mxu0 %v358_v3  ;;  %v356_v9 = vld [vmem:[%s1917_s1] sm:$0xff]  ;;  %v363_v11 = vld [vmem:[%s1917_s1 + $0x38] sm:$0xff]  ;;  %s354_s18 = scalar_lea.vmem %s1916_s0, %s1298_s26  ;;  %v362_v17 = vld [vmem:[%s1917_s1 + $0x30] sm:$0xff]  ;;  %s1231_s17 = sshll.u32 %s350_s30, 4  ;;  %s1232_s17 = int_to_ptr.vmem [resolvable:$true] %s1231_s17 }
  0x18   : > { %509 = vmatpush.msra.mxu2 %v366_v4  ;;  %v364_v10 = vld [vmem:[%s1917_s1 + $0x40] sm:$0xff]  ;;  %488 = vmatpush.msra.mxu1 %v363_v11  ;;  %v375_v14 = vld [vmem:[%s1917_s1 + $0x98] sm:$0xff]  ;;  %v374_v18 = vld [vmem:[%s1917_s1 + $0x90] sm:$0xff]  ;;  %s1428_s26 = sshra.s32 %s1234_s20, 4  ;;  %s1434_s25 = scalar_lea.hbm %s1926_s10, 16  ;;  %s1429_s26 = int_to_ptr.hbm [resolvable:$true] %s1428_s26 }
  0x19   : > { %529 = vmatpush.msra.mxu3 %v370_v5  ;;  %470 = vmatpush.msra.mxu0 %v357_v6  ;;  %v368_v12 = vld [vmem:[%s1917_s1 + $0x60] sm:$0xff]  ;;  %v383_v15 = vld [vmem:[%s1917_s1 + $0xd8] sm:$0xff]  ;;  %v382_v19 = vld [vmem:[%s1917_s1 + $0xd0] sm:$0xff]  ;;  %s1430_s22 = scalar_lea.hbm %s1429_s26, 8  ;;  %p1435_p0 = scmp.lt.s32.totalorder %s1429_s26, %s1926_s10 }
  0x1a   : > { %510 = vmatpush.msra.mxu2 %v365_v7  ;;  %v1626_v13 = vld [vmem:[%s354_s18] sm:$0xff]  ;;  %v387_v16 = vld [vmem:[%s1917_s1 + $0xf8] sm:$0xff]  ;;  %v386_v20 = vld [vmem:[%s1917_s1 + $0xf0] sm:$0xff]  ;;  %489 = vmatpush.msra.mxu1 %v362_v17  ;;  %p1431_p11 = scmp.ne.s32.totalorder %s1429_s26, %s1430_s22  ;;  %p1436_p1 = scmp.lt.s32.totalorder %s1434_s25, %s1430_s22 }
  0x1b   : > { %530 = vmatpush.msra.mxu3 %v369_v8  ;;  %471 = vmatpush.msra.mxu0 %v356_v9  ;;  %v361_v21 = vld [vmem:[%s1917_s1 + $0x28] sm:$0xff]  ;;  %v360_v25 = vld [vmem:[%s1917_s1 + $0x20] sm:$0xff]  ;;  %v379_v29 = vld [vmem:[%s1917_s1 + $0xb8] sm:$0xff] }
  0x1c   : > { %511 = vmatpush.msra.mxu2 %v364_v10  ;;  %1299 = vmatmul.msk.f32.vlgmr.msra.gmra.mxu0 %vm452_vm0, %v1626_v13  ;;  %v373_v22 = vld [vmem:[%s1917_s1 + $0x88] sm:$0xff]  ;;  %v372_v26 = vld [vmem:[%s1917_s1 + $0x80] sm:$0xff]  ;;  %v391_v30 = vld [vmem:[%s1917_s1 + $0x118] sm:$0xff]  ;;  %p1432_p12 = pnand %p1431_p11, %p1572_p5  ;;  %p1437_p2 = por %p1436_p1, %p1435_p0 }
  0x1d   : > { %531 = vmatpush.msra.mxu3 %v368_v12  ;;  %1301 = vmatmul.msk.f32.vlgmr.msra.gmra.mxu2 %vm452_vm0, %v1626_v13  ;;  %v381_v23 = vld [vmem:[%s1917_s1 + $0xc8] sm:$0xff]  ;;  %v380_v27 = vld [vmem:[%s1917_s1 + $0xc0] sm:$0xff]  ;;  %v378_v31 = vld [vmem:[%s1917_s1 + $0xb0] sm:$0xff] }
  0x1e   : > { %1302 = vmatmul.msk.f32.vlgmr.msra.gmra.mxu3 %vm452_vm0, %v1626_v13  ;;  %548 = vmatpush.msrb.mxu0 %v375_v14  ;;  %v385_v24 = vld [vmem:[%s1917_s1 + $0xe8] sm:$0xff]  ;;  %v384_v28 = vld [vmem:[%s1917_s1 + $0xe0] sm:$0xff]  ;;  %v390_v34 = vld [vmem:[%s1917_s1 + $0x110] sm:$0xff]  ;;  %p1433_p13 = pneg %p1432_p12 }
  0x1f   : > { %588 = vmatpush.msrb.mxu2 %v383_v15  ;;  %608 = vmatpush.msrb.mxu3 %v387_v16  ;;  %v377_v32 = vld [vmem:[%s1917_s1 + $0xa8] sm:$0xff]  ;;  %v376_v33 = vld [vmem:[%s1917_s1 + $0xa0] sm:$0xff]  ;;  %v399_v36 = vld [vmem:[%s1917_s1 + $0x158] sm:$0xff] }
  0x20   : > { %549 = vmatpush.msrb.mxu0 %v374_v18  ;;  %490 = vmatpush.msra.mxu1 %v361_v21  ;;  %v389_v35 = vld [vmem:[%s1917_s1 + $0x108] sm:$0xff]  ;;  %v403_v37 = vld [vmem:[%s1917_s1 + $0x178] sm:$0xff]  ;;  %v388_v38 = vld [vmem:[%s1917_s1 + $0x100] sm:$0xff]  ;;  %p1438_p3 = pnand %p1437_p2, %p1433_p13 }
  0x21   : > { %589 = vmatpush.msrb.mxu2 %v382_v19  ;;  %609 = vmatpush.msrb.mxu3 %v386_v20  ;;  %v395_v39 = vld [vmem:[%s1917_s1 + $0x138] sm:$0xff]  ;;  %v398_v40 = vld [vmem:[%s1917_s1 + $0x150] sm:$0xff]  ;;  %v397_v43 = vld [vmem:[%s1917_s1 + $0x148] sm:$0xff] }
  0x22   : > { %550 = vmatpush.msrb.mxu0 %v373_v22  ;;  %491 = vmatpush.msra.mxu1 %v360_v25  ;;  %v402_v41 = vld [vmem:[%s1917_s1 + $0x170] sm:$0xff]  ;;  %v401_v44 = vld [vmem:[%s1917_s1 + $0x168] sm:$0xff]  ;;  %v396_v46 = vld [vmem:[%s1917_s1 + $0x140] sm:$0xff] }
  0x23   : > { %590 = vmatpush.msrb.mxu2 %v381_v23  ;;  %610 = vmatpush.msrb.mxu3 %v385_v24  ;;  %v394_v42 = vld [vmem:[%s1917_s1 + $0x130] sm:$0xff]  ;;  %v393_v45 = vld [vmem:[%s1917_s1 + $0x128] sm:$0xff]  ;;  %v400_v47 = vld [vmem:[%s1917_s1 + $0x160] sm:$0xff] }
  0x24   : > { %551 = vmatpush.msrb.mxu0 %v372_v26  ;;  %1300 = vmatmul.msk.f32.vlgmr.msra.gmra.mxu1 %vm452_vm0, %v1626_v13  ;;  %v392_v48 = vld [vmem:[%s1917_s1 + $0x120] sm:$0xff]  ;;  %v1382_v9 = vld [vmem:[%s1918_s2 + $0x8] ss:$0 sm:$0xff]  ;;  %v1383_v12 = vld [vmem:[%s1918_s2 + $0x9] ss:$0 sm:$0xff] }
  0x25   : > { %591 = vmatpush.msrb.mxu2 %v380_v27  ;;  %611 = vmatpush.msrb.mxu3 %v384_v28  ;;  %v1378_v52 = vld [vmem:[%s1918_s2 + $0x4] ss:$0 sm:$0xff]  ;;  %v1374_v53 = vld [vmem:[%s1918_s2] ss:$0 sm:$0xff]  ;;  %v1379_v58 = vld [vmem:[%s1918_s2 + $0x6] ss:$0 sm:$0xff] }
  0x26   : > { %1303 = vmatmul.msk.f32.vlgmr.msrb.gmra.mxu0 %vm452_vm0, %v1626_v13  ;;  %1305 = vmatmul.msk.f32.vlgmr.msrb.gmra.mxu2 %vm452_vm0, %v1626_v13  ;;  %v1380_v59 = vld [vmem:[%s1918_s2 + $0x7] ss:$0 sm:$0xff]  ;;  %v1381_v60 = vld [vmem:[%s1918_s2 + $0x5] ss:$0 sm:$0xff]  ;;  %v1375_v61 = vld [vmem:[%s1918_s2 + $0x2] ss:$0 sm:$0xff] }
  0x27   : > { %1306 = vmatmul.msk.f32.vlgmr.msrb.gmra.mxu3 %vm452_vm0, %v1626_v13  ;;  %568 = vmatpush.msrb.mxu1 %v379_v29  ;;  %v1377_v62 = vld [vmem:[%s1918_s2 + $0x1] ss:$0 sm:$0xff]  ;;  %v1376_v0 = vld [vmem:[%s1918_s2 + $0x3] ss:$0 sm:$0xff]  ;;  %v1384_v16 = vld [vmem:[%s1918_s2 + $0xa] ss:$0 sm:$0xff] }
  0x28   : > { %628 = vmatpush.msra.mxu0 %v391_v30  ;;  %668 = vmatpush.msra.mxu2 %v399_v36  ;;  %v1385_v17 = vld [vmem:[%s1918_s2 + $0xb] ss:$0 sm:$0xff] }
  0x29   : > { %569 = vmatpush.msrb.mxu1 %v378_v31  ;;  %688 = vmatpush.msra.mxu3 %v403_v37 }
  0x2a   : > { %629 = vmatpush.msra.mxu0 %v390_v34  ;;  %669 = vmatpush.msra.mxu2 %v398_v40 }
  0x2b   : > { %570 = vmatpush.msrb.mxu1 %v377_v32  ;;  %689 = vmatpush.msra.mxu3 %v402_v41 }
  0x2c   : > { %630 = vmatpush.msra.mxu0 %v389_v35  ;;  %670 = vmatpush.msra.mxu2 %v397_v43 }
  0x2d   : > { %571 = vmatpush.msrb.mxu1 %v376_v33  ;;  %690 = vmatpush.msra.mxu3 %v401_v44 }
  0x2e   : > { %1304 = vmatmul.msk.f32.vlgmr.msrb.gmra.mxu1 %vm452_vm0, %v1626_v13  ;;  %631 = vmatpush.msra.mxu0 %v388_v38 }
  0x2f   : > { %1307 = vmatmul.msk.f32.vlgmr.msra.gmra.mxu0 %vm452_vm0, %v1626_v13  ;;  %648 = vmatpush.msra.mxu1 %v395_v39 }
  0x30   : > { %671 = vmatpush.msra.mxu2 %v396_v46  ;;  %691 = vmatpush.msra.mxu3 %v400_v47 }
  0x31   : > { %649 = vmatpush.msra.mxu1 %v394_v42  ;;  %1309 = vmatmul.msk.f32.vlgmr.msra.gmra.mxu2 %vm452_vm0, %v1626_v13 }
  0x32   : > { %1310 = vmatmul.msk.f32.vlgmr.msra.gmra.mxu3 %vm452_vm0, %v1626_v13 }
  0x33   : > { %650 = vmatpush.msra.mxu1 %v393_v45 }
  0x35   : > { %651 = vmatpush.msra.mxu1 %v392_v48 }
  0x36   : > { %1308 = vmatmul.msk.f32.vlgmr.msra.gmra.mxu1 %vm452_vm0, %v1626_v13 }
  0x99   : > { %v473_v49 = vpop.f32.mrf.mxu0 }
  0x9a   : > { %v474_v57 = vadd.f32 %v1374_v53, %v473_v49 }
  0xa0   : > { %v513_v50 = vpop.f32.mrf.mxu2 }
  0xa1   : > { %v533_v51 = vpop.f32.mrf.mxu3  ;;  %v493_v54 = vpop.f32.mrf.mxu1  ;;  %v514_v6 = vadd.f32 %v1375_v61, %v513_v50 }
  0xa2   : > { %v494_v7 = vadd.f32 %v1377_v62, %v493_v54  ;;  %v534_v8 = vadd.f32 %v1376_v0, %v533_v51 }
  0xa3   : > { %v553_v55 = vpop.f32.mrf.mxu0 }
  0xa4   : > { %v554_v56 = vadd.f32 %v1378_v52, %v553_v55 }
  0xa6   : > { %1311 = vmatpush.xpose.msk.msrb.mxu0 %vm696_vm1, %v554_v56 }
  0xa9   : > { %v593_v63 = vpop.f32.mrf.mxu2  ;;  %1312 = vmatmul.msk.f32.vlgmr.msrb.gmra.mxu0 %vm696_vm1, %v474_v57 }
  0xaa   : > { %v594_v1 = vadd.f32 %v1379_v58, %v593_v63  ;;  %v613_v2 = vpop.f32.mrf.mxu3 }
  0xab   : > { %v614_v3 = vadd.f32 %v1380_v59, %v613_v2  ;;  %v573_v4 = vpop.f32.mrf.mxu1 }
  0xac   : > { %v574_v5 = vadd.f32 %v1381_v60, %v573_v4  ;;  %1315 = vmatpush.xpose.msk.msrb.mxu2 %vm696_vm1, %v594_v1  ;;  %v633_v10 = vpop.f32.mrf.mxu0 }
  0xad   : > { %1317 = vmatpush.xpose.msk.msrb.mxu3 %vm696_vm1, %v614_v3  ;;  %v634_v11 = vadd.f32 %v1382_v9, %v633_v10 }
  0xae   : > { %1313 = vmatpush.xpose.msk.msrb.mxu1 %vm696_vm1, %v574_v5 }
  0xaf   : > { %1316 = vmatmul.msk.f32.vlgmr.msrb.gmra.mxu2 %vm696_vm1, %v514_v6  ;;  %919 = vmatpush.msra.mxu0 %v634_v11 }
  0xb0   : > { %1318 = vmatmul.msk.f32.vlgmr.msrb.gmra.mxu3 %vm696_vm1, %v534_v8 }
  0xb1   : > { %1314 = vmatmul.msk.f32.vlgmr.msrb.gmra.mxu1 %vm696_vm1, %v494_v7 }
  0xb3   : > { %v653_v14 = vpop.f32.mrf.mxu1 }
  0xb4   : > { %v654_v15 = vadd.f32 %v1383_v12, %v653_v14  ;;  %v673_v18 = vpop.f32.mrf.mxu2 }
  0xb5   : > { %v674_v19 = vadd.f32 %v1384_v16, %v673_v18  ;;  %v693_v20 = vpop.f32.mrf.mxu3 }
  0xb6   : > { %942 = vmatpush.msra.mxu1 %v654_v15  ;;  %v694_v21 = vadd.f32 %v1385_v17, %v693_v20 }
  0xb7   : > { %965 = vmatpush.msra.mxu2 %v674_v19 }
  0xb8   : > { %988 = vmatpush.msra.mxu3 %v694_v21 }
 0x126   : > { %v720_v22 = vpop.f32.mrf.mxu0 }
 0x127   : > { %v801_v23 = vmul.f32 0.35355338, %v720_v22 }
 0x129   : > { %v805_v24 = vsel %vm696_vm1, %v801_v23, -inf }
 0x12a   : > { %806 = vmax.xlane.f32.xlu1 %v805_v24 }
 0x12e   : > { %v746_v25 = vpop.f32.mrf.mxu1 }
 0x12f   : > { %v802_v26 = vmul.f32 0.35355338, %v746_v25 }
 0x131   : > { %v808_v27 = vsel %vm696_vm1, %v802_v26, -inf }
 0x132   : > { %v772_v28 = vpop.f32.mrf.mxu2  ;;  %809 = vmax.xlane.f32.xlu1 %v808_v27 }
 0x133   : > { %v803_v29 = vmul.f32 0.35355338, %v772_v28  ;;  %v798_v31 = vpop.f32.mrf.mxu3 }
 0x134   : > { %v804_v32 = vmul.f32 0.35355338, %v798_v31 }
 0x135   : > { %v811_v30 = vsel %vm696_vm1, %v803_v29, -inf }
 0x136   : > { %812 = vmax.xlane.f32.xlu0 %v811_v30  ;;  %v814_v33 = vsel %vm696_vm1, %v804_v32, -inf }
 0x13e   : > { %815 = vmax.xlane.f32.xlu0 %v814_v33 }
 0x19d   : > { %v807_v34 = vpop.xlane.xlu1 %806 }
 0x19e   : > { %v817_v35 = vsub.f32 %v801_v23, %v807_v34 }
 0x1a0   : > { %v821_v36 = vmul.f32 1.442695, %v817_v35 }
 0x1a2   : > { %1390 = vpow2.f32 %v821_v36 }
 0x1a5   : > { %v810_v37 = vpop.xlane.xlu1 %809 }
 0x1a6   : > { %v818_v38 = vsub.f32 %v802_v26, %v810_v37 }
 0x1a8   : > { %v1391_v39 = vpop.eup %1390  ;;  %v823_v40 = vmul.f32 1.442695, %v818_v38 }
 0x1a9   : > { %v813_v41 = vpop.xlane.xlu0 %812  ;;  %v829_v42 = vsel %vm696_vm1, %v1391_v39, 0.0 }
 0x1aa   : > { %1392 = vpow2.f32 %v823_v40  ;;  %v819_v43 = vsub.f32 %v803_v29, %v813_v41  ;;  %830 = vadd.xlane.f32.xlu0 %v829_v42  ;;  %v994_v40 = vld [vmem:[%s1919_s3 + $0x8] sm:$0xff]  ;;  %v995_v41 = vld [vmem:[%s1919_s3 + $0x10] sm:$0xff]  ;;  %v996_v42 = vld [vmem:[%s1919_s3 + $0x18] sm:$0xff] }
 0x1ab   : > { %1038 = vmatpush.msrb.mxu1 %v994_v40  ;;  %1061 = vmatpush.msrb.mxu2 %v995_v41 }
 0x1ac   : > { %v825_v44 = vmul.f32 1.442695, %v819_v43  ;;  %1084 = vmatpush.msrb.mxu3 %v996_v42 }
 0x1ae   : > { %1394 = vpow2.f32 %v825_v44 }
 0x1b0   : > { %v1393_v45 = vpop.eup %1392 }
 0x1b1   : > { %v816_v46 = vpop.xlane.xlu0 %815  ;;  %v832_v47 = vsel %vm696_vm1, %v1393_v45, 0.0 }
 0x1b2   : > { %v820_v48 = vsub.f32 %v804_v32, %v816_v46  ;;  %833 = vadd.xlane.f32.xlu1 %v832_v47  ;;  %v1108_v47 = vld [vmem:[%s1922_s6 + $0x18] sm:$0xff] }
 0x1b4   : > { %v1807_v49 = vpop.eup %1394  ;;  %v827_v50 = vmul.f32 1.442695, %v820_v48  ;;  %v1104_v48 = vld [vmem:[%s1921_s5 + $0x18] sm:$0xff] }
 0x1b5   : > { %v835_v51 = vsel %vm696_vm1, %v1807_v49, 0.0 }
 0x1b6   : > { %1396 = vpow2.f32 %v827_v50  ;;  %836 = vadd.xlane.f32.xlu2 %v835_v51  ;;  %v1103_v50 = vld [vmem:[%s1921_s5 + $0x10] sm:$0xff]  ;;  %v1106_v51 = vld [vmem:[%s1922_s6 + $0x8] sm:$0xff] }
 0x1bc   : > { %v1811_v52 = vpop.eup %1396 }
 0x1bd   : > { %v838_v53 = vsel %vm696_vm1, %v1811_v52, 0.0 }
 0x1be   : > { %839 = vadd.xlane.f32.xlu2 %v838_v53  ;;  %v1105_v53 = vld [vmem:[%s1922_s6] sm:$0xff] }
 0x21d   : > { %v831_v54 = vpop.xlane.xlu0 %830 }
 0x21e   : > { %1398 = vrcp.f32 %v831_v54  ;;  %v852_v59 = vand.u32 2147483648, %v831_v54  ;;  %v850_v61 = vand.u32 2147483647, %v831_v54  ;;  %vm846_vm3 = vweird.f32 %v831_v54 }
 0x220   : > { %v853_v1 = vor.u32 1.1754944e-38, %v852_v59  ;;  %vm851_vm5 = vcmp.eq.f32.partialorder %v850_v61, 8.507059e+37 }
 0x224   : > { %v1399_v55 = vpop.eup %1398 }
 0x225   : > { %v842_v56 = vmul.f32 %v1399_v55, %v831_v54  ;;  %v834_v57 = vpop.xlane.xlu1 %833  ;;  %vm847_vm2 = vweird.f32 %v1399_v55  ;;  %v1101_v54 = vld [vmem:[%s1921_s5] sm:$0xff] }
 0x226   : > { %1400 = vrcp.f32 %v834_v57  ;;  %vm848_vm4 = vmor %vm846_vm3, %vm847_vm2  ;;  %v864_v8 = vand.u32 2147483647, %v834_v57  ;;  %v866_v9 = vand.u32 2147483648, %v834_v57  ;;  %vm860_vm7 = vweird.f32 %v834_v57 }
 0x227   : > { %v843_v58 = vsub.f32 1.0, %v842_v56 }
 0x228   : > { %vm865_vm9 = vcmp.eq.f32.partialorder %v864_v8, 8.507059e+37  ;;  %v867_v16 = vor.u32 1.1754944e-38, %v866_v9 }
 0x229   : > { %v844_v60 = vmul.f32 %v1399_v55, %v843_v58  ;;  %v837_v62 = vpop.xlane.xlu2 %836 }
 0x22a   : > { %1402 = vrcp.f32 %v837_v62  ;;  %v880_v17 = vand.u32 2147483648, %v837_v62  ;;  %v878_v20 = vand.u32 2147483647, %v837_v62  ;;  %vm874_vm11 = vweird.f32 %v837_v62 }
 0x22b   : > { %v845_v63 = vadd.f32 %v1399_v55, %v844_v60 }
 0x22c   : > { %v1401_v0 = vpop.eup %1400  ;;  %v881_v25 = vor.u32 1.1754944e-38, %v880_v17  ;;  %vm879_vm13 = vcmp.eq.f32.partialorder %v878_v20, 8.507059e+37 }
 0x22d   : > { %v849_v2 = vsel %vm848_vm4, %v1399_v55, %v845_v63  ;;  %v856_v3 = vmul.f32 %v1401_v0, %v834_v57  ;;  %vm861_vm6 = vweird.f32 %v1401_v0 }
 0x22e   : > { %v854_v4 = vsel %vm851_vm5, %v853_v1, %v849_v2  ;;  %vm862_vm8 = vmor %vm860_vm7, %vm861_vm6 }
 0x22f   : > { %v857_v5 = vsub.f32 1.0, %v856_v3  ;;  %v897_v6 = vmul.f32 %v1391_v39, %v854_v4  ;;  %v993_v39 = vld [vmem:[%s1919_s3] sm:$0xff] }
 0x230   : > { %v1403_v7 = vpop.eup %1402  ;;  %1015 = vmatpush.msrb.mxu0 %v993_v39 }
 0x231   : > { %v858_v10 = vmul.f32 %v1401_v0, %v857_v5  ;;  %v870_v11 = vmul.f32 %v1403_v7, %v837_v62  ;;  %v840_v12 = vpop.xlane.xlu2 %839  ;;  %1319 = vmatmul.msk.f32.vlgmr.msra.gmra.mxu0 %vm696_vm1, %v897_v6  ;;  %vm875_vm10 = vweird.f32 %v1403_v7  ;;  %v1387_v5 = vld [vmem:[%s1923_s7] ss:$0 sm:$0xff] }
 0x232   : > { %1404 = vrcp.f32 %v840_v12  ;;  %vm876_vm12 = vmor %vm874_vm11, %vm875_vm10  ;;  %v894_v31 = vand.u32 2147483648, %v840_v12  ;;  %v892_v33 = vand.u32 2147483647, %v840_v12  ;;  %vm888_vm15 = vweird.f32 %v840_v12  ;;  %1124 = vmatpush.msra.mxu0 %v1108_v47 }
 0x233   : > { %v859_v14 = vadd.f32 %v1401_v0, %v858_v10  ;;  %v871_v15 = vsub.f32 1.0, %v870_v11 }
 0x234   : > { %v895_v35 = vor.u32 1.1754944e-38, %v894_v31  ;;  %vm893_vm3 = vcmp.eq.f32.partialorder %v892_v33, 8.507059e+37 }
 0x235   : > { %v863_v18 = vsel %vm862_vm8, %v1401_v0, %v859_v14  ;;  %v872_v19 = vmul.f32 %v1403_v7, %v871_v15  ;;  %v1386_v0 = vld [vmem:[%s1920_s4] ss:$0 sm:$0xff] }
 0x236   : > { %v868_v21 = vsel %vm865_vm9, %v867_v16, %v863_v18 }
 0x237   : > { %v898_v22 = vmul.f32 %v1393_v45, %v868_v21  ;;  %v873_v23 = vadd.f32 %v1403_v7, %v872_v19 }
 0x238   : > { %v1405_v24 = vpop.eup %1404 }
 0x239   : > { %v877_v26 = vsel %vm876_vm12, %v1403_v7, %v873_v23  ;;  %v884_v27 = vmul.f32 %v1405_v24, %v840_v12  ;;  %1320 = vmatmul.msk.f32.vlgmr.msra.gmra.mxu1 %vm696_vm1, %v898_v22  ;;  %vm889_vm14 = vweird.f32 %v1405_v24 }
 0x23a   : > { %v882_v28 = vsel %vm879_vm13, %v881_v25, %v877_v26  ;;  %vm890_vm2 = vmor %vm888_vm15, %vm889_vm14  ;;  %1144 = vmatpush.msra.mxu1 %v1104_v48  ;;  %v1478_v26 = vmov 32.0  }
 0x23b   : > { %v885_v29 = vsub.f32 1.0, %v884_v27  ;;  %v899_v30 = vmul.f32 %v1807_v49, %v882_v28  ;;  %v1107_v49 = vld [vmem:[%s1922_s6 + $0x10] sm:$0xff] }
 0x23c   : > { %1125 = vmatpush.msra.mxu0 %v1107_v49  ;;  %1145 = vmatpush.msra.mxu1 %v1103_v50  ;;  %v1389_v49 = vld [vmem:[%s1925_s9] ss:$0 sm:$0xff] }
 0x23d   : > { %v886_v32 = vmul.f32 %v1405_v24, %v885_v29  ;;  %1321 = vmatmul.msk.f32.vlgmr.msra.gmra.mxu2 %vm696_vm1, %v899_v30 }
 0x23e   : > { %1126 = vmatpush.msra.mxu0 %v1106_v51 }
 0x23f   : > { %v887_v34 = vadd.f32 %v1405_v24, %v886_v32 }
 0x240   : > { %1127 = vmatpush.msra.mxu0 %v1105_v53 }
 0x241   : > { %v891_v36 = vsel %vm890_vm2, %v1405_v24, %v887_v34 }
 0x242   : > { %v896_v37 = vsel %vm893_vm3, %v895_v35, %v891_v36 }
 0x243   : > { %v900_v38 = vmul.f32 %v1811_v52, %v896_v37  ;;  %v1102_v52 = vld [vmem:[%s1921_s5 + $0x8] sm:$0xff] }
 0x244   : > { %1146 = vmatpush.msra.mxu1 %v1102_v52 }
 0x245   : > { %1322 = vmatmul.msk.f32.vlgmr.msra.gmra.mxu3 %vm696_vm1, %v900_v38 }
 0x246   : > { %1147 = vmatpush.msra.mxu1 %v1101_v54 }
 0x2ae   : > { %v921_v43 = vpop.f32.mrf.mxu0 }
 0x2af   : > { %1323 = vmatmul.msk.f32.vlgmr.msrb.gmra.mxu0 %vm696_vm1, %v921_v43 }
 0x2b6   : > { %v944_v44 = vpop.f32.mrf.mxu1 }
 0x2b7   : > { %1324 = vmatmul.msk.f32.vlgmr.msrb.gmra.mxu1 %vm696_vm1, %v944_v44 }
 0x2bf   : > { %1328 = vmatmul.msk.f32.vlgmr.msra.gmra.mxu1 %vm452_vm0, %v1626_v13 }
 0x2c0   : > { %v967_v45 = vpop.f32.mrf.mxu2 }
 0x2c1   : > { %1325 = vmatmul.msk.f32.vlgmr.msrb.gmra.mxu2 %vm696_vm1, %v967_v45 }
 0x2c8   : > { %v990_v46 = vpop.f32.mrf.mxu3 }
 0x2c9   : > { %1326 = vmatmul.msk.f32.vlgmr.msrb.gmra.mxu3 %vm696_vm1, %v990_v46  ;;  %v1388_v46 = vld [vmem:[%s1924_s8] ss:$0 sm:$0xff] }
 0x32c   : > { %v1017_v56 = vpop.f32.mrf.mxu0 }
 0x32d   : > { %v1089_v59 = vsel %vm452_vm0, %v1017_v56, 0.0 }
 0x334   : > { %v1040_v55 = vpop.f32.mrf.mxu1 }
 0x335   : > { %v1090_v58 = vsel %vm452_vm0, %v1040_v55, 0.0 }
 0x336   : > { %v1091_v61 = vadd.f32 %v1090_v58, %v1089_v59 }
 0x33c   : > { %v1149_v4 = vpop.f32.mrf.mxu1 }
 0x344   : > { %v1063_v57 = vpop.f32.mrf.mxu2 }
 0x345   : > { %v1092_v60 = vsel %vm452_vm0, %v1063_v57, 0.0 }
 0x346   : > { %v1093_v62 = vadd.f32 %v1092_v60, %v1091_v61 }
 0x34c   : > { %v1086_v63 = vpop.f32.mrf.mxu3 }
 0x34d   : > { %v1094_v1 = vsel %vm452_vm0, %v1086_v63, 0.0 }
 0x34e   : > { %v1095_v2 = vadd.f32 %v1094_v1, %v1093_v62 }
 0x350   : > { %v1100_v3 = vadd.f32 %v1386_v0, %v1095_v2 }
 0x352   : > { %1327 = vmatmul.msk.f32.vlgmr.msra.gmra.mxu0 %vm452_vm0, %v1100_v3 }
 0x3cf   : > { %v1129_v6 = vpop.f32.mrf.mxu0 }
 0x3d0   : > { %v1150_v7 = vadd.f32 %v1149_v4, %v1129_v6 }
 0x3d2   : > { %v1156_v8 = vadd.f32 %v1387_v5, %v1150_v7 }
 0x3d4   : > { %v1329_v9 = vmul.f32 -1.442695, %v1156_v8 }
 0x3d6   : > { %1406 = vpow2.f32 %v1329_v9 }
 0x3dc   : > { %v1407_v10 = vpop.eup %1406 }
 0x3dd   : > { %v1160_v11 = vadd.f32 1.0, %v1407_v10 }
 0x3df   : > { %1408 = vrcp.f32 %v1160_v11  ;;  %v1172_v16 = vand.u32 2147483648, %v1160_v11  ;;  %v1170_v18 = vand.u32 2147483647, %v1160_v11  ;;  %vm1166_vm4 = vweird.f32 %v1160_v11 }
 0x3e0   : > { %1410 = vrcp.f32 %v1478_v26 }
 0x3e1   : > { %v1173_v20 = vor.u32 1.1754944e-38, %v1172_v16  ;;  %vm1171_vm6 = vcmp.eq.f32.partialorder %v1170_v18, 8.507059e+37 }
 0x3e5   : > { %v1409_v12 = vpop.eup %1408 }
 0x3e6   : > { %v1162_v14 = vmul.f32 %v1409_v12, %v1160_v11  ;;  %vm1167_vm1 = vweird.f32 %v1409_v12  ;;  %v1411_v27 = vpop.eup %1410 }
 0x3e7   : > { %vm1168_vm5 = vmor %vm1166_vm4, %vm1167_vm1  ;;  %v1182_v28 = vmul.f32 32.0, %v1411_v27  ;;  %vm1186_vm7 = vweird.f32 %v1411_v27 }
 0x3e8   : > { %v1163_v15 = vsub.f32 1.0, %v1162_v14 }
 0x3e9   : > { %v1183_v29 = vsub.f32 1.0, %v1182_v28 }
 0x3ea   : > { %v1164_v17 = vmul.f32 %v1409_v12, %v1163_v15 }
 0x3eb   : > { %v1184_v30 = vmul.f32 %v1411_v27, %v1183_v29 }
 0x3ec   : > { %v1165_v19 = vadd.f32 %v1409_v12, %v1164_v17 }
 0x3ed   : > { %v1185_v31 = vadd.f32 %v1411_v27, %v1184_v30 }
 0x3ee   : > { %v1169_v21 = vsel %vm1168_vm5, %v1409_v12, %v1165_v19 }
 0x3ef   : > { %v1174_v22 = vsel %vm1171_vm6, %v1173_v20, %v1169_v21  ;;  %v1187_v32 = vsel %vm1186_vm7, %v1411_v27, %v1185_v31 }
 0x3f0   : > { %v1176_v23 = vmul.f32 %v1174_v22, %v1100_v3 }
 0x3f2   : > { %v1177_v24 = vadd.f32 %v1176_v23, %v1626_v13 }
 0x3f4   : > { %v1178_v25 = vsel %vm452_vm0, %v1177_v24, 0.0 }
 0x3f5   : > { %1179 = vadd.xlane.f32.xlu2 %v1178_v25 }
 0x468   : > { %v1180_v33 = vpop.xlane.xlu2 %1179 }
 0x469   : > { %v1188_v34 = vmul.f32 %v1187_v32, %v1180_v33 }
 0x46b   : > { %v1189_v35 = vsub.f32 %v1177_v24, %v1188_v34 }
 0x46d   : > { %v1190_v36 = vmul.f32 %v1189_v35, %v1189_v35 }
 0x46f   : > { %v1191_v13 = vsel %vm452_vm0, %v1190_v36, 0.0 }
 0x470   : > { %1192 = vadd.xlane.f32.xlu0 %v1191_v13 }
 0x4e3   : > { %v1193_v37 = vpop.xlane.xlu0 %1192 }
 0x4e4   : > { %v1194_v38 = vmul.f32 %v1193_v37, %v1187_v32 }
 0x4e6   : > { %v1195_v39 = vadd.f32 1e-05, %v1194_v38 }
 0x4e8   : > { %1412 = vrsqrt.f32 %v1195_v39  ;;  %vm1202_vm9 = vweird.f32 %v1195_v39 }
 0x4ee   : > { %v1413_v40 = vpop.eup %1412 }
 0x4ef   : > { %v1197_v41 = vmul.f32 %v1413_v40, %v1195_v39  ;;  %vm1203_vm8 = vweird.f32 %v1413_v40 }
 0x4f0   : > { %vm1204_vm10 = vmor %vm1202_vm9, %vm1203_vm8 }
 0x4f1   : > { %v1198_v42 = vmul.f32 %v1413_v40, %v1197_v41 }
 0x4f3   : > { %v1199_v43 = vmul.f32 0.5, %v1198_v42 }
 0x4f5   : > { %v1200_v44 = vsub.f32 1.5, %v1199_v43 }
 0x4f7   : > { %v1201_v45 = vmul.f32 %v1413_v40, %v1200_v44 }
 0x4f9   : > { %v1205_v47 = vsel %vm1204_vm10, %v1413_v40, %v1201_v45 }
 0x4fa   : > { %v1206_v48 = vmul.f32 %v1205_v47, %v1189_v35 }
 0x4fc   : > { %v1211_v50 = vmul.f32 %v1388_v46, %v1206_v48 }
 0x4fe   : > { %v1216_v51 = vadd.f32 %v1389_v49, %v1211_v50 }
 0x500   : > { %1217 = vst.msk [vmem:[%s350_s30] sm:$0xff] %vm452_vm0, %v1216_v51 }
 0x501   : > { %1441 = shalt.err (!%p1438_p3)
}
 0x502   : > { %1334 = dma.vmem_to_hbm [thread:$0]  (%p1572_p5), %s1232_s17, 128, %s1234_s20, %s1219_s27  }
 0x503 PF: > { %p1340_p4 = scmp.ge.s32.totalorder %s1476_s16, 2  ;;  %s1245_s21 = sand.u32 1, %s1464_s13  }
 0x504   : > { %s1246_s18 = scalar_lea.sflag [#allocation3], %s1245_s21 }
 0x505   : > { %p1337_p7 = pnand %p1340_p4, %p1576_p6 }
 0x507   : > { %p1338_p8 = pneg %p1337_p7 }
 0x509   : > { %1459 = dma.done.wait (%p1338_p8), %s1246_s18, 128  }
 0x50a   : > { %1461 = vsyncadd (%p1338_p8), %s1246_s18, 4294967168  ;;  %s1930_s30 = sld [smem:[#allocation5_spill]]  ;;  %p20_p9 = scmp.ge.s32.totalorder %s1559_s19, 4  }
 0x50b   : > { %s1931_s13 = smov %s1468_s14  ;;  %s1932_s14 = smov %s1472_s15 }
 0x50c   : > { %s1934_s16 = smov %s1559_s19  ;;  %22 = sbr.rel (!%p20_p9) target bundleno = 3 (0x3), region = 95 }
 0x510   : > { %s1933_s15 = smov %s1930_s30 }
 0x511   :  { %1252 = vsyncpa [#allocation3], 1 }
 0x512   :  { %1254 = vsyncpa [#allocation3 + $0x1], 1 }

</bundles_post_ra>
